<compile_context>
chip_gen: v7x
topology: tpu7x:2x2x1
jax: 0.10.0
libtpu: 0.0.40
codegen_flags: <defaults>
</compile_context>

<pallas_src>
import jax
import jax.numpy as jnp
import numpy as np
from jax.experimental import pallas as pl
from jax.experimental.pallas import tpu as pltpu

OBS_DIM = 16
ACTION_DIM = 8
HIDDEN = 32
HEADS = 4
HEAD_DIM = HIDDEN // HEADS
BATCH = 8
LN_EPS = 1e-5
LANES = 128

# Column offsets inside the fused (128, 9*128) weight slab.
_ENC = 0 * LANES      # obs encoder (real rows 0:16)
_QKV = 1 * LANES      # fused q|k|v head expansion, 384 cols
_HS8 = 4 * LANES      # per-(h,g) block-sum selector
_HS32 = 5 * LANES     # per-head softmax-denominator selector
_ATTNF = 6 * LANES    # head gather folded into attn_fc
_W1 = 7 * LANES       # MLP linear 1
_W2 = 8 * LANES       # MLP linear 2 (action logits)
W_COLS = 9 * LANES


# ----------------------------------------------------------------------------- kernel
def actor_kernel(obs_ref, w_ref, b_ref, out_ref):
    bb = b_ref[...]                                    # (16, 128) f32 bias/mask slab

    def mm(x, col, width=LANES, rows=LANES):
        w = w_ref[0:rows, col:col + width]             # static, vreg-aligned slice
        return jnp.dot(x.astype(w.dtype), w, preferred_element_type=jnp.float32)

    def brow(r):
        return bb[r:r + 1, :]                          # (1,128), broadcasts over batch

    ln_mask = brow(11)                                 # 1.0 on the 32 real hidden lanes
    act_neg = brow(12)                                 # 0 on action lanes, -1e30 elsewhere

    def layernorm(x, gamma, beta):
        # x has exact zeros outside the 32 real lanes; gamma/beta zero-padded,
        # so padded lanes stay exactly zero after LN.
        mu = jnp.sum(x, axis=-1, keepdims=True) * (1.0 / HIDDEN)
        diff = (x - mu) * ln_mask
        var = jnp.sum(diff * diff, axis=-1, keepdims=True) * (1.0 / HIDDEN)
        return diff * jax.lax.rsqrt(var + LN_EPS) * gamma + beta

    obs = obs_ref[...]                                 # (Bb, 16) f32

    # Obs encoder: hidden lives in lanes 0..31, zeros elsewhere.
    x = mm(obs, _ENC, rows=OBS_DIM) + brow(0)

    # Fused head-expanded q/k/v: one (Bb,128)@(128,384) dot.
    # Lane c = (h*4+g)*8 + d holds q[b,h,d]*scale / k[b,g,d] / v[b,g,d].
    qkv = mm(x, _QKV, width=3 * LANES)
    qe = qkv[:, 0:LANES] + brow(1)
    ke = qkv[:, LANES:2 * LANES] + brow(2)
    ve = qkv[:, 2 * LANES:3 * LANES] + brow(3)

    # Attention over heads, fully lane-vectorized (selector matmuls, no loops).
    prod = qe * ke
    scores = mm(prod, _HS8)                            # score(h,g), bcast over its 8 d-lanes
    m = jnp.max(scores, axis=-1, keepdims=True)        # shared shift (softmax invariant)
    e = jnp.exp(scores - m)
    denom = mm(e, _HS32)                               # per-head sum over g, bcast over 32 lanes
    inv = pl.reciprocal(denom + 1e-30, approx=True)    # EUP slot; eps guards underflowed heads
    wv = e * inv * ve                                  # softmax weight * v, head-expanded

    # Sum over g + attn_fc fused in one weight block; residual + LayerNorm1.
    x = layernorm(x + mm(wv, _ATTNF) + brow(4), brow(5), brow(6))

    # MLP head: Linear -> ReLU -> LayerNorm -> Linear -> masked softmax.
    h1 = jnp.maximum(mm(x, _W1) + brow(7), 0.0)
    h1 = layernorm(h1, brow(8), brow(9))
    logits = mm(h1, _W2) + brow(10)                    # actions in lanes 0..7

    shifted = logits + act_neg                         # padding lanes forced to -1e30
    lm = jnp.max(shifted, axis=-1, keepdims=True)      # masked max (no NaN if all logits << 0)
    el = jnp.exp(shifted - lm)                         # padding lanes underflow to exactly 0
    out_ref[...] = el / jnp.sum(el, axis=-1, keepdims=True)


# ----------------------------------------------------------------------------- wrapper
def _rup(x, m):
    return ((x + m - 1) // m) * m


def actor_forward(obs, w_slab, b_slab):
    B = obs.shape[0]
    b_pad = _rup(max(B, 1), 16)                        # 16-row granularity (bf16-friendly)
    if b_pad > 512:
        n_blk = -(-b_pad // 512)
        block_b = _rup(-(-b_pad // n_blk), 16)
    elif b_pad >= 32:
        block_b = _rup(b_pad // 2, 16)                 # >=2 grid steps -> both v7x TCs engage
    else:
        block_b = b_pad
    b_pad = _rup(b_pad, block_b)

    obs_p = obs.astype(jnp.float32)
    if b_pad != B:
        obs_p = jnp.pad(obs_p, ((0, b_pad - B), (0, 0)))   # batch pad only, no lane pad

    out = pl.pallas_call(
        actor_kernel,
        out_shape=jax.ShapeDtypeStruct((b_pad, LANES), jnp.float32),
        grid=(b_pad // block_b,),
        in_specs=[
            pl.BlockSpec((block_b, OBS_DIM), lambda i: (i, 0)),
            pl.BlockSpec(w_slab.shape, lambda i: (0, 0)),
            pl.BlockSpec(b_slab.shape, lambda i: (0, 0)),
        ],
        out_specs=pl.BlockSpec((block_b, LANES), lambda i: (i, 0)),
        compiler_params=pltpu.CompilerParams(
            dimension_semantics=("parallel",)),
    )(obs_p, w_slab, b_slab)
    return out[:B, :ACTION_DIM]


# ----------------------------------------------------------------------------- packing
def pack_params(params, dtype=jnp.bfloat16):
    """Host-side packing into one lane-dense (128, 9*128) weight slab (cast to
    `dtype`, bf16 by default) and one f32 (16, 128) bias/mask slab.
    Expanded-attention lane layout: c = (h*4+g)*8 + d."""
    p = [np.asarray(a, np.float32) for a in params]
    (w_enc, b_enc, w_q, b_q, w_k, b_k, w_v, b_v,
     w_fc, b_fc, g1, bt1, w1, b1, g2, bt2, w2, b2) = p
    scale = np.float32(1.0 / np.sqrt(HEAD_DIM))

    RQ = np.zeros((HIDDEN, LANES), np.float32)   # replicate q head h over g
    RK = np.zeros((HIDDEN, LANES), np.float32)   # tile k/v head g over h
    G = np.zeros((LANES, HIDDEN), np.float32)    # sum over g back to (h, d)
    for c in range(LANES):
        h, g, d = c // 32, (c // 8) % 4, c % 8
        RQ[h * HEAD_DIM + d, c] = 1.0
        RK[g * HEAD_DIM + d, c] = 1.0
        G[c, h * HEAD_DIM + d] = 1.0
    idx = np.arange(LANES)
    HS8 = (idx[:, None] // HEAD_DIM == idx[None, :] // HEAD_DIM).astype(np.float32)
    HS32 = (idx[:, None] // HIDDEN == idx[None, :] // HIDDEN).astype(np.float32)
    HS32 /= HEAD_DIM  # undo d-replication in the per-head softmax denominator

    def blk(w):
        out = np.zeros((LANES, LANES), np.float32)
        out[:w.shape[0], :w.shape[1]] = w
        return out

    w_slab = np.concatenate([
        blk(w_enc),                # cols 0:128    obs encoder (real rows 0:16)
        blk((w_q @ RQ) * scale),   # cols 128:256  q expansion, scale folded in
        blk(w_k @ RK),             # cols 256:384  k expansion
        blk(w_v @ RK),             # cols 384:512  v expansion
        HS8,                       # cols 512:640  per-(h,g) block-sum selector
        HS32,                      # cols 640:768  per-head denominator selector
        blk(G @ w_fc),             # cols 768:896  head gather folded into attn_fc
        blk(w1),                   # cols 896:1024
        blk(w2),                   # cols 1024:1152
    ], axis=1)
    assert w_slab.shape == (LANES, W_COLS)

    def row(v):
        r = np.zeros((LANES,), np.float32)
        v = np.asarray(v, np.float32).reshape(-1)
        r[:v.shape[0]] = v
        return r

    ln_mask = np.zeros((LANES,), np.float32)
    ln_mask[:HIDDEN] = 1.0
    act_neg = np.full((LANES,), -1e30, np.float32)
    act_neg[:ACTION_DIM] = 0.0

    rows = [row(b_enc),
            row((b_q.reshape(1, -1) @ RQ).reshape(-1) * scale),
            row((b_k.reshape(1, -1) @ RK).reshape(-1)),
            row((b_v.reshape(1, -1) @ RK).reshape(-1)),
            row(b_fc), row(g1), row(bt1),
            row(b1), row(g2), row(bt2), row(b2),
            ln_mask, act_neg]
    b_slab = np.zeros((16, LANES), np.float32)
    b_slab[:len(rows)] = np.stack(rows, axis=0)
    return jnp.asarray(w_slab, dtype=dtype), jnp.asarray(b_slab)


# ----------------------------------------------------------------------------- init & reference
def init_params(key):
    """Deterministic PyTorch-Linear-style init; weights stored as (in, out)."""
    def linear(key, fan_in, fan_out):
        k1, k2 = jax.random.split(key)
        bound = 1.0 / np.sqrt(fan_in)
        w = jax.random.uniform(k1, (fan_in, fan_out), jnp.float32, -bound, bound)
        b = jax.random.uniform(k2, (1, fan_out), jnp.float32, -bound, bound)
        return w, b

    keys = jax.random.split(key, 8)
    w_enc, b_enc = linear(keys[0], OBS_DIM, HIDDEN)
    w_q, b_q = linear(keys[1], HIDDEN, HIDDEN)
    w_k, b_k = linear(keys[2], HIDDEN, HIDDEN)
    w_v, b_v = linear(keys[3], HIDDEN, HIDDEN)
    w_fc, b_fc = linear(keys[4], HIDDEN, HIDDEN)
    g1 = jnp.ones((1, HIDDEN), jnp.float32)
    bt1 = jnp.zeros((1, HIDDEN), jnp.float32)
    w1, b1 = linear(keys[5], HIDDEN, HIDDEN)
    g2 = jnp.ones((1, HIDDEN), jnp.float32)
    bt2 = jnp.zeros((1, HIDDEN), jnp.float32)
    w2, b2 = linear(keys[6], HIDDEN, ACTION_DIM)
    return (w_enc, b_enc, w_q, b_q, w_k, b_k, w_v, b_v,
            w_fc, b_fc, g1, bt1, w1, b1, g2, bt2, w2, b2)


def _layernorm(x, gamma, beta):
    mu = jnp.mean(x, axis=-1, keepdims=True)
    var = jnp.mean((x - mu) ** 2, axis=-1, keepdims=True)
    return (x - mu) * jax.lax.rsqrt(var + LN_EPS) * gamma + beta


def actor_reference(obs, params):
    """Pure-JAX f32 reference mirroring the PyTorch forward exactly."""
    (w_enc, b_enc, w_q, b_q, w_k, b_k, w_v, b_v,
     w_fc, b_fc, g1, bt1, w1, b1, g2, bt2, w2, b2) = params
    x = obs @ w_enc + b_enc
    B = x.shape[0]
    q = (x @ w_q + b_q).reshape(B, HEADS, HEAD_DIM)
    k = (x @ w_k + b_k).reshape(B, HEADS, HEAD_DIM)
    v = (x @ w_v + b_v).reshape(B, HEADS, HEAD_DIM)
    scores = jnp.einsum("bhd,bgd->bhg", q, k) / (HEAD_DIM ** 0.5)
    w = jax.nn.softmax(scores, axis=-1)
    attn = jnp.einsum("bhg,bgd->bhd", w, v).reshape(B, HIDDEN)
    x = x + attn @ w_fc + b_fc
    x = _layernorm(x, g1, bt1)
    h1 = jnp.maximum(x @ w1 + b1, 0.0)
    h1 = _layernorm(h1, g2, bt2)
    return jax.nn.softmax(h1 @ w2 + b2, axis=-1)


if __name__ == "__main__":
    key = jax.random.PRNGKey(0)
    k_obs, k_params = jax.random.split(key)
    obs = jax.random.normal(k_obs, (BATCH, OBS_DIM), jnp.float32)
    params = init_params(k_params)
    w_slab, b_slab = pack_params(params, dtype=jnp.bfloat16)

    out = actor_forward(obs, w_slab, b_slab)
    out = jax.block_until_ready(out)

    ref = actor_reference(obs, params)
    out_np, ref_np = np.asarray(out), np.asarray(ref)
    assert out_np.shape == (BATCH, ACTION_DIM)
    assert np.isfinite(out_np).all()
    # bf16 weights + f32 accumulation: ~1e-3-level error vs the f32 reference.
    assert np.allclose(out_np, ref_np, atol=3e-2, rtol=0.0)
    assert np.allclose(out_np.sum(axis=-1), 1.0, atol=1e-4)

    print("KERNEL_OK")
</pallas_src>

<mosaic_0001>
module attributes {stable_mosaic.version = 11 : i64} {
  func.func @actor_kernel(%arg0: i32, %arg1: memref<16x16xf32, #tpu.memory_space<vmem>>, %arg2: memref<128x1152xbf16, #tpu.memory_space<vmem>>, %arg3: memref<16x128xf32, #tpu.memory_space<vmem>>, %arg4: memref<16x128xf32, #tpu.memory_space<vmem>>) attributes {dimension_semantics = [#tpu.dimension_semantics<parallel>], iteration_bounds = array<i64: 1>, scalar_prefetch = 0 : i64, scratch_operands = 0 : i64, tpu.core_type = #tpu.core_type<tc>, window_params = [{transform_indices = @transform_0, window_bounds = array<i64: 16, 16>}, {pipeline_mode = #tpu.pipeline_mode<synchronous>, transform_indices = @transform_1, window_bounds = array<i64: 128, 1152>}, {pipeline_mode = #tpu.pipeline_mode<synchronous>, transform_indices = @transform_2, window_bounds = array<i64: 16, 128>}, {transform_indices = @transform_3, window_bounds = array<i64: 16, 128>}]} {
    %c0 = arith.constant 0 : index
    %c0_0 = arith.constant 0 : index
    %0 = vector.load %arg3[%c0, %c0_0] : memref<16x128xf32, #tpu.memory_space<vmem>>, vector<16x128xf32>
    %1 = vector.extract_strided_slice %0 {offsets = [11, 0], sizes = [1, 128], strides = [1, 1]} : vector<16x128xf32> to vector<1x128xf32>
    %2 = vector.extract_strided_slice %0 {offsets = [12, 0], sizes = [1, 128], strides = [1, 1]} : vector<16x128xf32> to vector<1x128xf32>
    %c0_1 = arith.constant 0 : index
    %c0_2 = arith.constant 0 : index
    %3 = vector.load %arg1[%c0_1, %c0_2] : memref<16x16xf32, #tpu.memory_space<vmem>>, vector<16x16xf32>
    %c0_3 = arith.constant 0 : index
    %c0_4 = arith.constant 0 : index
    %4 = vector.load %arg2[%c0_3, %c0_4] : memref<128x1152xbf16, #tpu.memory_space<vmem>>, vector<16x128xbf16>
    %5 = arith.truncf %3 : vector<16x16xf32> to vector<16x16xbf16>
    %cst = arith.constant dense<0.000000e+00> : vector<16x128xf32>
    %6 = tpu.matmul %5, %4, %cst {dimension_numbers = #tpu.dot_dimension_numbers<[1], [0], [0], [1], [0, 0, 1, 1], [], []>} : vector<16x16xbf16>, vector<16x128xbf16>, vector<16x128xf32> -> vector<16x128xf32>
    %7 = vector.extract_strided_slice %0 {offsets = [0, 0], sizes = [1, 128], strides = [1, 1]} : vector<16x128xf32> to vector<1x128xf32>
    %8 = vector.broadcast %7 : vector<1x128xf32> to vector<16x128xf32>
    %9 = arith.addf %6, %8 : vector<16x128xf32>
    %c0_5 = arith.constant 0 : index
    %c128 = arith.constant 128 : index
    %10 = vector.load %arg2[%c0_5, %c128] : memref<128x1152xbf16, #tpu.memory_space<vmem>>, vector<128x384xbf16>
    %11 = arith.truncf %9 : vector<16x128xf32> to vector<16x128xbf16>
    %cst_6 = arith.constant dense<0.000000e+00> : vector<16x384xf32>
    %12 = tpu.matmul %11, %10, %cst_6 {dimension_numbers = #tpu.dot_dimension_numbers<[1], [0], [0], [1], [0, 0, 1, 1], [], []>} : vector<16x128xbf16>, vector<128x384xbf16>, vector<16x384xf32> -> vector<16x384xf32>
    %13 = vector.extract_strided_slice %12 {offsets = [0, 0], sizes = [16, 128], strides = [1, 1]} : vector<16x384xf32> to vector<16x128xf32>
    %14 = vector.extract_strided_slice %0 {offsets = [1, 0], sizes = [1, 128], strides = [1, 1]} : vector<16x128xf32> to vector<1x128xf32>
    %15 = vector.broadcast %14 : vector<1x128xf32> to vector<16x128xf32>
    %16 = arith.addf %13, %15 : vector<16x128xf32>
    %17 = vector.extract_strided_slice %12 {offsets = [0, 128], sizes = [16, 128], strides = [1, 1]} : vector<16x384xf32> to vector<16x128xf32>
    %18 = vector.extract_strided_slice %0 {offsets = [2, 0], sizes = [1, 128], strides = [1, 1]} : vector<16x128xf32> to vector<1x128xf32>
    %19 = vector.broadcast %18 : vector<1x128xf32> to vector<16x128xf32>
    %20 = arith.addf %17, %19 : vector<16x128xf32>
    %21 = vector.extract_strided_slice %12 {offsets = [0, 256], sizes = [16, 128], strides = [1, 1]} : vector<16x384xf32> to vector<16x128xf32>
    %22 = vector.extract_strided_slice %0 {offsets = [3, 0], sizes = [1, 128], strides = [1, 1]} : vector<16x128xf32> to vector<1x128xf32>
    %23 = vector.broadcast %22 : vector<1x128xf32> to vector<16x128xf32>
    %24 = arith.addf %21, %23 : vector<16x128xf32>
    %25 = arith.mulf %16, %20 : vector<16x128xf32>
    %c0_7 = arith.constant 0 : index
    %c512 = arith.constant 512 : index
    %26 = vector.load %arg2[%c0_7, %c512] : memref<128x1152xbf16, #tpu.memory_space<vmem>>, vector<128x128xbf16>
    %27 = arith.truncf %25 : vector<16x128xf32> to vector<16x128xbf16>
    %cst_8 = arith.constant dense<0.000000e+00> : vector<16x128xf32>
    %28 = tpu.matmul %27, %26, %cst_8 {dimension_numbers = #tpu.dot_dimension_numbers<[1], [0], [0], [1], [0, 0, 1, 1], [], []>} : vector<16x128xbf16>, vector<128x128xbf16>, vector<16x128xf32> -> vector<16x128xf32>
    %cst_9 = arith.constant dense<0xFF800000> : vector<16xf32>
    %29 = vector.multi_reduction <maximumf>, %28, %cst_9 [1] : vector<16x128xf32> to vector<16xf32>
    %30 = vector.shape_cast %29 : vector<16xf32> to vector<16x1xf32>
    %31 = vector.broadcast %30 : vector<16x1xf32> to vector<16x128xf32>
    %32 = arith.subf %28, %31 : vector<16x128xf32>
    %33 = math.exp %32 : vector<16x128xf32>
    %c0_10 = arith.constant 0 : index
    %c640 = arith.constant 640 : index
    %34 = vector.load %arg2[%c0_10, %c640] : memref<128x1152xbf16, #tpu.memory_space<vmem>>, vector<128x128xbf16>
    %35 = arith.truncf %33 : vector<16x128xf32> to vector<16x128xbf16>
    %cst_11 = arith.constant dense<0.000000e+00> : vector<16x128xf32>
    %36 = tpu.matmul %35, %34, %cst_11 {dimension_numbers = #tpu.dot_dimension_numbers<[1], [0], [0], [1], [0, 0, 1, 1], [], []>} : vector<16x128xbf16>, vector<128x128xbf16>, vector<16x128xf32> -> vector<16x128xf32>
    %cst_12 = arith.constant 1.000000e-30 : f32
    %37 = vector.broadcast %cst_12 : f32 to vector<16x128xf32>
    %38 = arith.addf %36, %37 : vector<16x128xf32>
    %39 = tpu.reciprocal %38 {approx = true} : vector<16x128xf32> -> vector<16x128xf32>
    %40 = arith.mulf %33, %39 : vector<16x128xf32>
    %41 = arith.mulf %40, %24 : vector<16x128xf32>
    %c0_13 = arith.constant 0 : index
    %c768 = arith.constant 768 : index
    %42 = vector.load %arg2[%c0_13, %c768] : memref<128x1152xbf16, #tpu.memory_space<vmem>>, vector<128x128xbf16>
    %43 = arith.truncf %41 : vector<16x128xf32> to vector<16x128xbf16>
    %cst_14 = arith.constant dense<0.000000e+00> : vector<16x128xf32>
    %44 = tpu.matmul %43, %42, %cst_14 {dimension_numbers = #tpu.dot_dimension_numbers<[1], [0], [0], [1], [0, 0, 1, 1], [], []>} : vector<16x128xbf16>, vector<128x128xbf16>, vector<16x128xf32> -> vector<16x128xf32>
    %45 = arith.addf %9, %44 : vector<16x128xf32>
    %46 = vector.extract_strided_slice %0 {offsets = [4, 0], sizes = [1, 128], strides = [1, 1]} : vector<16x128xf32> to vector<1x128xf32>
    %47 = vector.broadcast %46 : vector<1x128xf32> to vector<16x128xf32>
    %48 = arith.addf %45, %47 : vector<16x128xf32>
    %49 = vector.extract_strided_slice %0 {offsets = [5, 0], sizes = [1, 128], strides = [1, 1]} : vector<16x128xf32> to vector<1x128xf32>
    %50 = vector.extract_strided_slice %0 {offsets = [6, 0], sizes = [1, 128], strides = [1, 1]} : vector<16x128xf32> to vector<1x128xf32>
    %cst_15 = arith.constant dense<0.000000e+00> : vector<16xf32>
    %51 = vector.multi_reduction <add>, %48, %cst_15 [1] : vector<16x128xf32> to vector<16xf32>
    %52 = vector.shape_cast %51 : vector<16xf32> to vector<16x1xf32>
    %cst_16 = arith.constant 3.125000e-02 : f32
    %53 = vector.broadcast %cst_16 : f32 to vector<16x1xf32>
    %54 = arith.mulf %52, %53 : vector<16x1xf32>
    %55 = vector.broadcast %54 : vector<16x1xf32> to vector<16x128xf32>
    %56 = arith.subf %48, %55 : vector<16x128xf32>
    %57 = vector.broadcast %1 : vector<1x128xf32> to vector<16x128xf32>
    %58 = arith.mulf %56, %57 : vector<16x128xf32>
    %59 = arith.mulf %58, %58 : vector<16x128xf32>
    %cst_17 = arith.constant dense<0.000000e+00> : vector<16xf32>
    %60 = vector.multi_reduction <add>, %59, %cst_17 [1] : vector<16x128xf32> to vector<16xf32>
    %61 = vector.shape_cast %60 : vector<16xf32> to vector<16x1xf32>
    %cst_18 = arith.constant 3.125000e-02 : f32
    %62 = vector.broadcast %cst_18 : f32 to vector<16x1xf32>
    %63 = arith.mulf %61, %62 : vector<16x1xf32>
    %cst_19 = arith.constant 9.99999974E-6 : f32
    %64 = vector.broadcast %cst_19 : f32 to vector<16x1xf32>
    %65 = arith.addf %63, %64 : vector<16x1xf32>
    %66 = math.rsqrt %65 : vector<16x1xf32>
    %67 = vector.broadcast %66 : vector<16x1xf32> to vector<16x128xf32>
    %68 = arith.mulf %58, %67 : vector<16x128xf32>
    %69 = vector.broadcast %49 : vector<1x128xf32> to vector<16x128xf32>
    %70 = arith.mulf %68, %69 : vector<16x128xf32>
    %71 = vector.broadcast %50 : vector<1x128xf32> to vector<16x128xf32>
    %72 = arith.addf %70, %71 : vector<16x128xf32>
    %c0_20 = arith.constant 0 : index
    %c896 = arith.constant 896 : index
    %73 = vector.load %arg2[%c0_20, %c896] : memref<128x1152xbf16, #tpu.memory_space<vmem>>, vector<128x128xbf16>
    %74 = arith.truncf %72 : vector<16x128xf32> to vector<16x128xbf16>
    %cst_21 = arith.constant dense<0.000000e+00> : vector<16x128xf32>
    %75 = tpu.matmul %74, %73, %cst_21 {dimension_numbers = #tpu.dot_dimension_numbers<[1], [0], [0], [1], [0, 0, 1, 1], [], []>} : vector<16x128xbf16>, vector<128x128xbf16>, vector<16x128xf32> -> vector<16x128xf32>
    %76 = vector.extract_strided_slice %0 {offsets = [7, 0], sizes = [1, 128], strides = [1, 1]} : vector<16x128xf32> to vector<1x128xf32>
    %77 = vector.broadcast %76 : vector<1x128xf32> to vector<16x128xf32>
    %78 = arith.addf %75, %77 : vector<16x128xf32>
    %cst_22 = arith.constant 0.000000e+00 : f32
    %79 = vector.broadcast %cst_22 : f32 to vector<16x128xf32>
    %80 = arith.maximumf %78, %79 : vector<16x128xf32>
    %81 = vector.extract_strided_slice %0 {offsets = [8, 0], sizes = [1, 128], strides = [1, 1]} : vector<16x128xf32> to vector<1x128xf32>
    %82 = vector.extract_strided_slice %0 {offsets = [9, 0], sizes = [1, 128], strides = [1, 1]} : vector<16x128xf32> to vector<1x128xf32>
    %cst_23 = arith.constant dense<0.000000e+00> : vector<16xf32>
    %83 = vector.multi_reduction <add>, %80, %cst_23 [1] : vector<16x128xf32> to vector<16xf32>
    %84 = vector.shape_cast %83 : vector<16xf32> to vector<16x1xf32>
    %cst_24 = arith.constant 3.125000e-02 : f32
    %85 = vector.broadcast %cst_24 : f32 to vector<16x1xf32>
    %86 = arith.mulf %84, %85 : vector<16x1xf32>
    %87 = vector.broadcast %86 : vector<16x1xf32> to vector<16x128xf32>
    %88 = arith.subf %80, %87 : vector<16x128xf32>
    %89 = vector.broadcast %1 : vector<1x128xf32> to vector<16x128xf32>
    %90 = arith.mulf %88, %89 : vector<16x128xf32>
    %91 = arith.mulf %90, %90 : vector<16x128xf32>
    %cst_25 = arith.constant dense<0.000000e+00> : vector<16xf32>
    %92 = vector.multi_reduction <add>, %91, %cst_25 [1] : vector<16x128xf32> to vector<16xf32>
    %93 = vector.shape_cast %92 : vector<16xf32> to vector<16x1xf32>
    %cst_26 = arith.constant 3.125000e-02 : f32
    %94 = vector.broadcast %cst_26 : f32 to vector<16x1xf32>
    %95 = arith.mulf %93, %94 : vector<16x1xf32>
    %cst_27 = arith.constant 9.99999974E-6 : f32
    %96 = vector.broadcast %cst_27 : f32 to vector<16x1xf32>
    %97 = arith.addf %95, %96 : vector<16x1xf32>
    %98 = math.rsqrt %97 : vector<16x1xf32>
    %99 = vector.broadcast %98 : vector<16x1xf32> to vector<16x128xf32>
    %100 = arith.mulf %90, %99 : vector<16x128xf32>
    %101 = vector.broadcast %81 : vector<1x128xf32> to vector<16x128xf32>
    %102 = arith.mulf %100, %101 : vector<16x128xf32>
    %103 = vector.broadcast %82 : vector<1x128xf32> to vector<16x128xf32>
    %104 = arith.addf %102, %103 : vector<16x128xf32>
    %c0_28 = arith.constant 0 : index
    %c1024 = arith.constant 1024 : index
    %105 = vector.load %arg2[%c0_28, %c1024] : memref<128x1152xbf16, #tpu.memory_space<vmem>>, vector<128x128xbf16>
    %106 = arith.truncf %104 : vector<16x128xf32> to vector<16x128xbf16>
    %cst_29 = arith.constant dense<0.000000e+00> : vector<16x128xf32>
    %107 = tpu.matmul %106, %105, %cst_29 {dimension_numbers = #tpu.dot_dimension_numbers<[1], [0], [0], [1], [0, 0, 1, 1], [], []>} : vector<16x128xbf16>, vector<128x128xbf16>, vector<16x128xf32> -> vector<16x128xf32>
    %108 = vector.extract_strided_slice %0 {offsets = [10, 0], sizes = [1, 128], strides = [1, 1]} : vector<16x128xf32> to vector<1x128xf32>
    %109 = vector.broadcast %108 : vector<1x128xf32> to vector<16x128xf32>
    %110 = arith.addf %107, %109 : vector<16x128xf32>
    %111 = vector.broadcast %2 : vector<1x128xf32> to vector<16x128xf32>
    %112 = arith.addf %110, %111 : vector<16x128xf32>
    %cst_30 = arith.constant dense<0xFF800000> : vector<16xf32>
    %113 = vector.multi_reduction <maximumf>, %112, %cst_30 [1] : vector<16x128xf32> to vector<16xf32>
    %114 = vector.shape_cast %113 : vector<16xf32> to vector<16x1xf32>
    %115 = vector.broadcast %114 : vector<16x1xf32> to vector<16x128xf32>
    %116 = arith.subf %112, %115 : vector<16x128xf32>
    %117 = math.exp %116 : vector<16x128xf32>
    %cst_31 = arith.constant dense<0.000000e+00> : vector<16xf32>
    %118 = vector.multi_reduction <add>, %117, %cst_31 [1] : vector<16x128xf32> to vector<16xf32>
    %119 = vector.shape_cast %118 : vector<16xf32> to vector<16x1xf32>
    %120 = vector.broadcast %119 : vector<16x1xf32> to vector<16x128xf32>
    %121 = arith.divf %117, %120 : vector<16x128xf32>
    %c0_32 = arith.constant 0 : index
    %c0_33 = arith.constant 0 : index
    %122 = vector.load %arg4[%c0_32, %c0_33] : memref<16x128xf32, #tpu.memory_space<vmem>>, vector<16x128xf32>
    tpu.vector_store %arg4[%c0_32, %c0_33], %121 {strides = array<i32>} : memref<16x128xf32, #tpu.memory_space<vmem>>, vector<16x128xf32>,
    return
  }
  func.func @transform_0(%arg0: i32) -> (i32, i32) {
    %c0_i32 = arith.constant 0 : i32
    %c0_i32_0 = arith.constant 0 : i32
    return %arg0, %c0_i32 : i32, i32
  }
  func.func @transform_1(%arg0: i32) -> (i32, i32) {
    %c0_i32 = arith.constant 0 : i32
    %c0_i32_0 = arith.constant 0 : i32
    %c0_i32_1 = arith.constant 0 : i32
    return %c0_i32, %c0_i32_0 : i32, i32
  }
  func.func @transform_2(%arg0: i32) -> (i32, i32) {
    %c0_i32 = arith.constant 0 : i32
    %c0_i32_0 = arith.constant 0 : i32
    %c0_i32_1 = arith.constant 0 : i32
    return %c0_i32, %c0_i32_0 : i32, i32
  }
  func.func @transform_3(%arg0: i32) -> (i32, i32) {
    %c0_i32 = arith.constant 0 : i32
    %c0_i32_0 = arith.constant 0 : i32
    return %arg0, %c0_i32 : i32, i32
  }
}

</mosaic_0001>

<bundles_post_ra>
// kernel: tpu_custom_call.1
= control target key start
LH: loop header
LB: loop body
LE: loop exit
PB: predicated region body
PF: predicated region fallthrough
CT: control target
= control target key end

     0   :  { %8 = vsyncpa [#allocation3], 0  ;;  %s1732_s0 = inlined_call_operand.hbm [shape: f32[16,16], index: 0, kind: input, shape index: {}]   ;;  %s1733_s1 = inlined_call_operand.hbm [shape: bf16[128,1152], index: 1, kind: input, shape index: {}]   ;;  %s1734_s2 = inlined_call_operand.hbm [shape: f32[16,128], index: 2, kind: input, shape index: {}]   ;;  %s1735_s3 = inlined_call_operand.hbm [shape: f32[16,128], index: 3, kind: output, shape index: {}]  }
   0x1   :  { %9 = vsyncpa [#allocation6], 0 }
   0x2   :  { %10 = vsyncpa [#allocation4], 0  ;;  %s1518_s12 = smov [#allocation5]   ;;  %s1424_s16 = scalar_lea.hbm %s1733_s1, 9216 }
   0x3   :  { %s28_s13 = sshll.u32 %s1518_s12, 4  ;;  %p1425_p0 = scmp.ne.s32.totalorder %s1733_s1, %s1424_s16  ;;  %s29_s13 = int_to_ptr.vmem [resolvable:$true] %s28_s13 }
   0x4   :  { %p1428_p1 = scmp.lt.u32.totalorder %s1424_s16, %s1733_s1 }
   0x6   :  { %p1430_p2 = pnand %p1428_p1, %p1425_p0 }
   0x8   :  { %1433 = shalt.err (!%p1430_p2)
}
   0x9   :  { %s1434_s21 = scalar_lea.vmem %s29_s13, 9216  ;;  %p1439_p4 = scmp.lt.s32.totalorder %s29_s13, %s29_s13 }
   0xa   :  { %p1435_p3 = scmp.ne.s32.totalorder %s29_s13, %s1434_s21  ;;  %p1440_p5 = scmp.lt.s32.totalorder %s1434_s21, %s1434_s21 }
   0xc   :  { %p1441_p6 = por %p1440_p5, %p1439_p4 }
   0xe   :  { %p1442_p7 = pnand %p1441_p6, %p1435_p3 }
  0x10   :  { %1445 = shalt.err (!%p1442_p7)
}
  0x11   :  { %s1519_s22 = smov 576   ;;  %s1520_s23 = smov 36  }
  0x12   :  { %34 = dma.hbm_to_vmem [thread:$0]  %s1733_s1, 9216, %s29_s13, [#allocation6], %s1519_s22, %s1519_s22, %s1520_s23  }
  0x13   :  { %s1521_s26 = smov [#allocation2]   ;;  %s1446_s30 = scalar_lea.hbm %s1732_s0, 256 }
  0x14   :  { %s16_s27 = sshll.u32 %s1521_s26, 4  ;;  %p1447_p8 = scmp.ne.s32.totalorder %s1732_s0, %s1446_s30  ;;  %s17_s27 = int_to_ptr.vmem [resolvable:$true] %s16_s27 }
  0x15   :  { %p1450_p9 = scmp.lt.u32.totalorder %s1446_s30, %s1732_s0 }
  0x17   :  { %p1452_p10 = pnand %p1450_p9, %p1447_p8 }
  0x19   :  { %1455 = shalt.err (!%p1452_p10)
}
  0x1a   :  { %s1456_s8 = scalar_lea.vmem %s17_s27, 256  ;;  %p1461_p12 = scmp.lt.s32.totalorder %s17_s27, %s17_s27 }
  0x1b   :  { %p1457_p11 = scmp.ne.s32.totalorder %s17_s27, %s1456_s8  ;;  %p1462_p13 = scmp.lt.s32.totalorder %s1456_s8, %s1456_s8 }
  0x1d   :  { %p1463_p0 = por %p1462_p13, %p1461_p12 }
  0x1f   :  { %p1464_p1 = pnand %p1463_p0, %p1457_p11 }
  0x21   :  { %1467 = shalt.err (!%p1464_p1)
}
  0x22   :  { %s1522_s1 = smov 128   ;;  %s1523_s9 = smov 8  }
  0x23   :  { %22 = dma.hbm_to_vmem [thread:$0]  %s1732_s0, 256, %s17_s27, [#allocation3], %s1522_s1, %s1522_s1, %s1523_s9  }
  0x24   :  { %s1524_s12 = smov [#allocation7]   ;;  %s1468_s16 = scalar_lea.hbm %s1734_s2, 256 }
  0x25   :  { %s40_s13 = sshll.u32 %s1524_s12, 4  ;;  %p1469_p2 = scmp.ne.s32.totalorder %s1734_s2, %s1468_s16  ;;  %s41_s13 = int_to_ptr.vmem [resolvable:$true] %s40_s13 }
  0x26   :  { %p1472_p3 = scmp.lt.u32.totalorder %s1468_s16, %s1734_s2 }
  0x28   :  { %p1474_p4 = pnand %p1472_p3, %p1469_p2 }
  0x2a   :  { %1477 = shalt.err (!%p1474_p4)
}
  0x2b   :  { %s1478_s21 = scalar_lea.vmem %s41_s13, 256  ;;  %p1483_p6 = scmp.lt.s32.totalorder %s41_s13, %s41_s13 }
  0x2c   :  { %p1479_p5 = scmp.ne.s32.totalorder %s41_s13, %s1478_s21  ;;  %p1484_p7 = scmp.lt.s32.totalorder %s1478_s21, %s1478_s21 }
  0x2e   :  { %p1485_p8 = por %p1484_p7, %p1483_p6 }
  0x30   :  { %p1486_p9 = pnand %p1485_p8, %p1479_p5 }
  0x32   :  { %1489 = shalt.err (!%p1486_p9)
}
  0x33   :  { %46 = dma.hbm_to_vmem [thread:$0]  %s1734_s2, 256, %s41_s13, [#allocation6], %s1522_s1, %s1522_s1, %s1523_s9  }
  0x34   :  { %1512 = dma.done.wait [#allocation3], 256  }
  0x35   :  { %1513 = vsyncadd [#allocation3], 4294967040 }
  0x36   :  { %1514 = dma.done.wait [#allocation6], 9472  }
  0x37   :  { %1515 = vsyncadd [#allocation6], 4294957824  ;;  %v1525_v0 = vmov 0.0   ;;  %vm1526_vm0 = vmmov 0   ;;  %v1327_v1 = vld [vmem:[#allocation5] ss:$36 sps:$4 sm:$0xff]   ;;  %v64_v30 = vlaneseq }
  0x38   :  { %1190 = vmatprep.subr.bf16.mxu0 %v1525_v0  ;;  %1192 = vmatprep.mubr.msk.bf16.mxu0 %vm1526_vm0, %v1525_v0  ;;  %v59_v2 = vld [vmem:[#allocation2] sm:$0xff]  ;;  %v60_v3 = vld [vmem:[#allocation2 + $0x8] sm:$0xff]  ;;  %vm74_vm1 = vcmask 130048   ;;  %v1328_v5 = vld [vmem:[#allocation5 + $0x8] ss:$36 sps:$4 sm:$0xff]   ;;  %v1527_v29 = vmov 0  }
  0x39   :  { %1191 = vmatpush3.bf16.msra.mxu0 %v1327_v1  ;;  %v63_v4 = vpack.c.bf16 %v60_v3, %v59_v2  ;;  %v1330_v6 = vld [vmem:[#allocation5 + $0x4] ss:$36 sps:$4 sm:$0xff]   ;;  %v1331_v7 = vld [vmem:[#allocation5 + $0xc] ss:$36 sps:$4 sm:$0xff]   ;;  %280 = vmatprep.subr.bf16.mxu1 %v1328_v5  ;;  %v1335_v10 = vld [vmem:[#allocation5 + $0x54] ss:$36 sps:$4 sm:$0xff]  }
  0x3a   :  { %1196 = vmatprep.subr.bf16.mxu0 %v1525_v0  ;;  %v1332_v8 = vld [vmem:[#allocation5 + $0x50] ss:$36 sps:$4 sm:$0xff]   ;;  %281 = vmatpush1.bf16.msra.mxu1 %v1330_v6  ;;  %v1336_v11 = vld [vmem:[#allocation5 + $0x98] ss:$36 sps:$4 sm:$0xff]   ;;  %v1340_v14 = vld [vmem:[#allocation5 + $0xe0] ss:$36 sps:$4 sm:$0xff]  }
  0x3b   :  { %v1334_v9 = vld [vmem:[#allocation5 + $0x4c] ss:$36 sps:$4 sm:$0xff]   ;;  %282 = vmatprep.subr.bf16.mxu1 %v1332_v8  ;;  %v1338_v12 = vld [vmem:[#allocation5 + $0x94] ss:$36 sps:$4 sm:$0xff]   ;;  %v1339_v13 = vld [vmem:[#allocation5 + $0x9c] ss:$36 sps:$4 sm:$0xff]   ;;  %312 = vmatprep.mubr.bf16.mxu1 %v1527_v29 }
  0x3c   :  { %1193 = vmatmul.mubr.msk.bf16.vlgmr.msra.gmra.mrb[0].mxu0 %vm74_vm1, %v63_v4  ;;  %v1342_v15 = vld [vmem:[#allocation5 + $0xdc] ss:$36 sps:$4 sm:$0xff]   ;;  %v1343_v16 = vld [vmem:[#allocation5 + $0xe4] ss:$36 sps:$4 sm:$0xff]   ;;  %v1347_v19 = vld [vmem:[#allocation5 + $0x12c] ss:$36 sps:$4 sm:$0xff]  }
  0x3d   :  { %1197 = vmatpush3.bf16.msra.mxu0 %v1331_v7  ;;  %1212 = vmatprep.mubr.msk.bf16.mxu0 %vm1526_vm0, %v1525_v0  ;;  %v1344_v17 = vld [vmem:[#allocation5 + $0x128] ss:$36 sps:$4 sm:$0xff]   ;;  %v1348_v20 = vld [vmem:[#allocation5 + $0x170] ss:$36 sps:$4 sm:$0xff]   ;;  %v1352_v23 = vld [vmem:[#allocation5 + $0x1b8] ss:$36 sps:$4 sm:$0xff]  }
  0x3e   :  { %1198 = vmatprep.subr.bf16.mxu0 %v1525_v0  ;;  %283 = vmatpush1.bf16.msra.mxu1 %v1334_v9  ;;  %v1346_v18 = vld [vmem:[#allocation5 + $0x124] ss:$36 sps:$4 sm:$0xff]   ;;  %v1350_v21 = vld [vmem:[#allocation5 + $0x16c] ss:$36 sps:$4 sm:$0xff]   ;;  %v1351_v22 = vld [vmem:[#allocation5 + $0x174] ss:$36 sps:$4 sm:$0xff]  }
  0x3f   :  { %284 = vmatprep.subr.bf16.mxu1 %v1336_v11  ;;  %v1354_v24 = vld [vmem:[#allocation5 + $0x1b4] ss:$36 sps:$4 sm:$0xff]   ;;  %v1355_v25 = vld [vmem:[#allocation5 + $0x1bc] ss:$36 sps:$4 sm:$0xff]   ;;  %v1359_v28 = vld [vmem:[#allocation5 + $0x204] ss:$36 sps:$4 sm:$0xff]  }
  0x40   :  { %v1356_v26 = vld [vmem:[#allocation5 + $0x200] ss:$36 sps:$4 sm:$0xff]   ;;  %v1606_v31 = vshrl.u32 %v64_v30, 7  ;;  %v1360_v41 = vld [vmem:[#allocation5 + $0x10] ss:$36 sps:$4 sm:$0xff]   ;;  %s1528_s2 = smov [#allocation8]  }
  0x41   :  { %1199 = vmatpush3.bf16.msra.mxu0 %v1335_v10  ;;  %v1358_v27 = vld [vmem:[#allocation5 + $0x1fc] ss:$36 sps:$4 sm:$0xff]   ;;  %v1363_v45 = vld [vmem:[#allocation5 + $0xe8] ss:$36 sps:$4 sm:$0xff]   ;;  %v1364_v46 = vld [vmem:[#allocation5 + $0x130] ss:$36 sps:$4 sm:$0xff]  }
  0x42   :  { %1200 = vmatprep.subr.bf16.mxu0 %v1525_v0  ;;  %285 = vmatpush1.bf16.msra.mxu1 %v1338_v12  ;;  %v66_v32 = vsub.s32 0, %v1606_v31  ;;  %v1609_v33 = vld [vmem:[#allocation7] sm:$0xff]  ;;  %v1361_v43 = vld [vmem:[#allocation5 + $0x58] ss:$36 sps:$4 sm:$0xff]   ;;  %v1367_v49 = vld [vmem:[#allocation5 + $0x208] ss:$36 sps:$4 sm:$0xff]  }
  0x43   :  { %286 = vmatprep.subr.bf16.mxu1 %v1340_v14  ;;  %v1362_v44 = vld [vmem:[#allocation5 + $0xa0] ss:$36 sps:$4 sm:$0xff]   ;;  %v1365_v47 = vld [vmem:[#allocation5 + $0x178] ss:$36 sps:$4 sm:$0xff]   ;;  %v366_v50 = vsub.s32 1, %v1606_v31  ;;  %v372_v51 = vsub.s32 2, %v1606_v31 }
  0x44   :  { %v67_v34 = vrot.slane %v1609_v33, %v66_v32  ;;  %v1366_v48 = vld [vmem:[#allocation5 + $0x1c0] ss:$36 sps:$4 sm:$0xff]   ;;  %v1368_v6 = vld [vmem:[#allocation5 + $0x14] ss:$36 sps:$4 sm:$0xff]   ;;  %s1055_s23 = sshll.u32 %s1528_s2, 4  ;;  %s1056_s23 = int_to_ptr.vmem [resolvable:$true] %s1055_s23 }
  0x45   :  { %1201 = vmatpush3.bf16.msra.mxu0 %v1339_v13  ;;  %v367_v52 = vrot.slane %v1609_v33, %v366_v50  ;;  %v373_v53 = vrot.slane %v1609_v33, %v372_v51  ;;  %v1369_v7 = vld [vmem:[#allocation5 + $0x5c] ss:$36 sps:$4 sm:$0xff]   ;;  %v1370_v8 = vld [vmem:[#allocation5 + $0xa4] ss:$36 sps:$4 sm:$0xff]   ;;  %v1371_v13 = vld [vmem:[#allocation5 + $0xec] ss:$36 sps:$4 sm:$0xff]   ;;  %p1495_p11 = scmp.lt.s32.totalorder %s1056_s23, %s1056_s23 }
  0x46   :  { %1202 = vmatprep.subr.bf16.mxu0 %v1525_v0  ;;  %287 = vmatpush1.bf16.msra.mxu1 %v1342_v15  ;;  %v1372_v14 = vld [vmem:[#allocation5 + $0x134] ss:$36 sps:$4 sm:$0xff]   ;;  %v1373_v15 = vld [vmem:[#allocation5 + $0x17c] ss:$36 sps:$4 sm:$0xff]   ;;  %s1490_s24 = scalar_lea.vmem %s1056_s23, 256 }
  0x47   :  { %288 = vmatprep.subr.bf16.mxu1 %v1344_v17  ;;  %v1375_v17 = vld [vmem:[#allocation5 + $0x20c] ss:$36 sps:$4 sm:$0xff]   ;;  %p1491_p10 = scmp.ne.s32.totalorder %s1056_s23, %s1490_s24  ;;  %p1496_p12 = scmp.lt.s32.totalorder %s1490_s24, %s1490_s24 }
  0x48   :  { %v1379_v30 = vld [vmem:[#allocation5 + $0xf0] ss:$36 sps:$4 sm:$0xff]  }
  0x49   :  { %1203 = vmatpush3.bf16.msra.mxu0 %v1343_v16  ;;  %v1374_v16 = vld [vmem:[#allocation5 + $0x1c4] ss:$36 sps:$4 sm:$0xff]   ;;  %p1497_p13 = por %p1496_p12, %p1495_p11 }
  0x4a   :  { %1204 = vmatprep.subr.bf16.mxu0 %v1525_v0  ;;  %289 = vmatpush1.bf16.msra.mxu1 %v1346_v18  ;;  %v1376_v18 = vld [vmem:[#allocation5 + $0x18] ss:$36 sps:$4 sm:$0xff]  }
  0x4b   :  { %290 = vmatprep.subr.bf16.mxu1 %v1348_v20  ;;  %v1378_v20 = vld [vmem:[#allocation5 + $0xa8] ss:$36 sps:$4 sm:$0xff]   ;;  %p1498_p0 = pnand %p1497_p13, %p1491_p10 }
  0x4d   :  { %1205 = vmatpush3.bf16.msra.mxu0 %v1347_v19  ;;  %v1377_v19 = vld [vmem:[#allocation5 + $0x60] ss:$36 sps:$4 sm:$0xff]  }
  0x4e   :  { %1206 = vmatprep.subr.bf16.mxu0 %v1525_v0  ;;  %291 = vmatpush1.bf16.msra.mxu1 %v1350_v21 }
  0x4f   :  { %292 = vmatprep.subr.bf16.mxu1 %v1352_v23 }
  0x51   :  { %1207 = vmatpush3.bf16.msra.mxu0 %v1351_v22 }
  0x52   :  { %1208 = vmatprep.subr.bf16.mxu0 %v1525_v0  ;;  %293 = vmatpush1.bf16.msra.mxu1 %v1354_v24 }
  0x53   :  { %294 = vmatprep.subr.bf16.mxu1 %v1356_v26 }
  0x55   :  { %1209 = vmatpush3.bf16.msra.mxu0 %v1355_v25 }
  0x56   :  { %1210 = vmatprep.subr.bf16.mxu0 %v1525_v0  ;;  %295 = vmatpush1.bf16.msra.mxu1 %v1358_v27 }
  0x57   :  { %1216 = vmatprep.subr.bf16.mxu1 %v1525_v0 }
  0x59   :  { %1211 = vmatpush3.bf16.msra.mxu0 %v1359_v28 }
  0x5a   :  { %1236 = vmatprep.subr.bf16.mxu0 %v1525_v0 }
 0x10f   :  { %v112_v35 = vpop.f32.mrb[0].mxu0 }
 0x110   :  { %v1194_v36 = vpop.f32.mrb[1].mxu0  ;;  %v1614_v38 = vadd.f32 %v112_v35, %v67_v34  ;;  %v1381_v35 = vld [vmem:[#allocation5 + $0x180] ss:$36 sps:$4 sm:$0xff]  }
 0x111   :  { %v115_v37 = vpop.f32.mrb[2].mxu0  ;;  %v1382_v36 = vld [vmem:[#allocation5 + $0x1c8] ss:$36 sps:$4 sm:$0xff]  }
 0x112   :  { %v1616_v39 = vadd.f32 %v115_v37, %v67_v34  ;;  %v1195_v40 = vpop.f32.mrb[3].mxu0  ;;  %v1380_v34 = vld [vmem:[#allocation5 + $0x138] ss:$36 sps:$4 sm:$0xff]   ;;  %v1383_v37 = vld [vmem:[#allocation5 + $0x210] ss:$36 sps:$4 sm:$0xff]  }
 0x114   :  { %v151_v42 = vpack.c.bf16 %v1616_v39, %v1614_v38 }
 0x116   :  { %313 = vmatmul.mubr.bf16.vlgmr.msra.gmra.mrb[0].mxu1 %v151_v42  ;;  %1213 = vmatmul.mubr.bf16.vlgmr.msra.gmra.mrb[4].mxu0 %v151_v42 }
 0x117   :  { %1217 = vmatpush3.bf16.msra.mxu1 %v1360_v41  ;;  %1232 = vmatprep.mubr.msk.bf16.mxu1 %vm1526_vm0, %v1525_v0 }
 0x118   :  { %1218 = vmatprep.subr.bf16.mxu1 %v1525_v0  ;;  %1252 = vmatprep.mubr.msk.bf16.mxu0 %vm1526_vm0, %v1525_v0 }
 0x119   :  { %1237 = vmatpush3.bf16.msra.mxu0 %v1368_v6  ;;  %v1384_v6 = vld [vmem:[#allocation5 + $0x1c] ss:$36 sps:$4 sm:$0xff]  }
 0x11a   :  { %1238 = vmatprep.subr.bf16.mxu0 %v1525_v0 }
 0x11b   :  { %1219 = vmatpush3.bf16.msra.mxu1 %v1361_v43 }
 0x11c   :  { %1220 = vmatprep.subr.bf16.mxu1 %v1525_v0 }
 0x11d   :  { %1239 = vmatpush3.bf16.msra.mxu0 %v1369_v7  ;;  %v1677_v7 = vld [vmem:[#allocation7 + $0x8] sm:$0xff] }
 0x11e   :  { %1240 = vmatprep.subr.bf16.mxu0 %v1525_v0 }
 0x11f   :  { %1221 = vmatpush3.bf16.msra.mxu1 %v1362_v44 }
 0x120   :  { %1222 = vmatprep.subr.bf16.mxu1 %v1525_v0 }
 0x121   :  { %1241 = vmatpush3.bf16.msra.mxu0 %v1370_v8 }
 0x122   :  { %1242 = vmatprep.subr.bf16.mxu0 %v1525_v0 }
 0x123   :  { %1223 = vmatpush3.bf16.msra.mxu1 %v1363_v45 }
 0x124   :  { %1224 = vmatprep.subr.bf16.mxu1 %v1525_v0 }
 0x125   :  { %1243 = vmatpush3.bf16.msra.mxu0 %v1371_v13 }
 0x126   :  { %1244 = vmatprep.subr.bf16.mxu0 %v1525_v0 }
 0x127   :  { %1225 = vmatpush3.bf16.msra.mxu1 %v1364_v46  ;;  %v378_v46 = vsub.s32 3, %v1606_v31 }
 0x128   :  { %1226 = vmatprep.subr.bf16.mxu1 %v1525_v0 }
 0x129   :  { %1245 = vmatpush3.bf16.msra.mxu0 %v1372_v14 }
 0x12a   :  { %1246 = vmatprep.subr.bf16.mxu0 %v1525_v0 }
 0x12b   :  { %1227 = vmatpush3.bf16.msra.mxu1 %v1365_v47  ;;  %v379_v47 = vrot.slane %v1609_v33, %v378_v46 }
 0x12c   :  { %1228 = vmatprep.subr.bf16.mxu1 %v1525_v0 }
 0x12d   :  { %1247 = vmatpush3.bf16.msra.mxu0 %v1373_v15 }
 0x12e   :  { %1248 = vmatprep.subr.bf16.mxu0 %v1525_v0 }
 0x12f   :  { %1229 = vmatpush3.bf16.msra.mxu1 %v1366_v48 }
 0x130   :  { %1230 = vmatprep.subr.bf16.mxu1 %v1525_v0 }
 0x131   :  { %1249 = vmatpush3.bf16.msra.mxu0 %v1374_v16 }
 0x132   :  { %1250 = vmatprep.subr.bf16.mxu0 %v1525_v0 }
 0x133   :  { %1231 = vmatpush3.bf16.msra.mxu1 %v1367_v49 }
 0x134   :  { %1256 = vmatprep.subr.bf16.mxu1 %v1525_v0 }
 0x135   :  { %1251 = vmatpush3.bf16.msra.mxu0 %v1375_v17  ;;  %v1385_v17 = vld [vmem:[#allocation5 + $0x64] ss:$36 sps:$4 sm:$0xff]  }
 0x136   :  { %1276 = vmatprep.subr.bf16.mxu0 %v1525_v0 }
 0x1e9   :  { %v314_v54 = vpop.f32.mrb[0].mxu1  ;;  %v1640_v55 = vpop.f32.mrb[4].mxu0 }
 0x1ea   :  { %v368_v56 = vadd.f32 %v367_v52, %v314_v54  ;;  %v316_v57 = vpop.f32.mrb[1].mxu1  ;;  %v1214_v58 = vpop.f32.mrb[5].mxu0  ;;  %v380_v49 = vadd.f32 %v379_v47, %v1640_v55 }
 0x1eb   :  { %v374_v59 = vadd.f32 %v373_v53, %v316_v57  ;;  %v318_v60 = vpop.f32.mrb[2].mxu1  ;;  %v1642_v61 = vpop.f32.mrb[6].mxu0 }
 0x1ec   :  { %v369_v62 = vadd.f32 %v367_v52, %v318_v60  ;;  %v320_v63 = vpop.f32.mrb[3].mxu1  ;;  %v1215_v1 = vpop.f32.mrb[7].mxu0  ;;  %v381_v54 = vadd.f32 %v379_v47, %v1642_v61  ;;  %v722_v60 = vsub.s32 4, %v1606_v31 }
 0x1ed   :  { %v382_v2 = vmul.f32 %v374_v59, %v368_v56  ;;  %v375_v3 = vadd.f32 %v373_v53, %v320_v63 }
 0x1ef   :  { %v383_v4 = vmul.f32 %v375_v3, %v369_v62  ;;  %v723_v62 = vrot.slane %v1609_v33, %v722_v60 }
 0x1f1   :  { %v400_v5 = vpack.c.bf16 %v383_v4, %v382_v2 }
 0x1f3   :  { %1233 = vmatmul.mubr.bf16.vlgmr.msra.gmra.mrb[4].mxu1 %v400_v5 }
 0x1f4   :  { %1272 = vmatprep.mubr.msk.bf16.mxu1 %vm1526_vm0, %v1525_v0  ;;  %1257 = vmatpush3.bf16.msra.mxu1 %v1376_v18  ;;  %v1386_v18 = vld [vmem:[#allocation5 + $0xac] ss:$36 sps:$4 sm:$0xff]  }
 0x1f5   :  { %1258 = vmatprep.subr.bf16.mxu1 %v1525_v0 }
 0x1f8   :  { %1259 = vmatpush3.bf16.msra.mxu1 %v1377_v19  ;;  %v1387_v19 = vld [vmem:[#allocation5 + $0xf4] ss:$36 sps:$4 sm:$0xff]  }
 0x1f9   :  { %1260 = vmatprep.subr.bf16.mxu1 %v1525_v0 }
 0x1fc   :  { %1261 = vmatpush3.bf16.msra.mxu1 %v1378_v20  ;;  %v1388_v20 = vld [vmem:[#allocation5 + $0x13c] ss:$36 sps:$4 sm:$0xff]  }
 0x1fd   :  { %1262 = vmatprep.subr.bf16.mxu1 %v1525_v0 }
 0x200   :  { %1263 = vmatpush3.bf16.msra.mxu1 %v1379_v30  ;;  %v756_v30 = vsub.s32 5, %v1606_v31 }
 0x201   :  { %1264 = vmatprep.subr.bf16.mxu1 %v1525_v0 }
 0x204   :  { %1265 = vmatpush3.bf16.msra.mxu1 %v1380_v34 }
 0x205   :  { %1266 = vmatprep.subr.bf16.mxu1 %v1525_v0 }
 0x208   :  { %1267 = vmatpush3.bf16.msra.mxu1 %v1381_v35 }
 0x209   :  { %1268 = vmatprep.subr.bf16.mxu1 %v1525_v0 }
 0x20c   :  { %1269 = vmatpush3.bf16.msra.mxu1 %v1382_v36  ;;  %v757_v36 = vrot.slane %v1609_v33, %v756_v30  ;;  %v934_v30 = vrot.slane %v1677_v7, %v372_v51 }
 0x20d   :  { %1270 = vmatprep.subr.bf16.mxu1 %v1525_v0 }
 0x210   :  { %1271 = vmatpush3.bf16.msra.mxu1 %v1383_v37  ;;  %v762_v37 = vsub.s32 6, %v1606_v31 }
 0x211   :  { %1296 = vmatprep.subr.bf16.mxu1 %v1525_v0 }
 0x2c6   :  { %v483_v9 = vpop.f32.mrb[4].mxu1 }
 0x2c7   :  { %490 = vmax.xlane.f32.xlu0 %v483_v9  ;;  %v1234_v10 = vpop.f32.mrb[5].mxu1 }
 0x2c8   :  { %v486_v11 = vpop.f32.mrb[6].mxu1 }
 0x2c9   :  { %v1235_v12 = vpop.f32.mrb[7].mxu1 }
 0x2cb   :  { %492 = vmax.xlane.f32.xlu0 %v486_v11 }
 0x354   :  { %v491_v21 = vpop.xlane.xlu0 %490 }
 0x355   :  { %v494_v22 = vsub.f32 %v483_v9, %v491_v21  ;;  %v1680_v9 = vrot.slane %v1677_v7, %v378_v46  ;;  %v1389_v21 = vld [vmem:[#allocation5 + $0x184] ss:$36 sps:$4 sm:$0xff]  }
 0x357   :  { %v496_v23 = vmul.f32 1.442695, %v494_v22  ;;  %v1390_v22 = vld [vmem:[#allocation5 + $0x1cc] ss:$36 sps:$4 sm:$0xff]  }
 0x358   :  { %v493_v24 = vpop.xlane.xlu0 %492 }
 0x359   :  { %v495_v25 = vsub.f32 %v486_v11, %v493_v24  ;;  %1400 = vpow2.f32 %v496_v23  ;;  %v1391_v23 = vld [vmem:[#allocation5 + $0x214] ss:$36 sps:$4 sm:$0xff]  }
 0x35b   :  { %v498_v26 = vmul.f32 1.442695, %v495_v25 }
 0x35d   :  { %1402 = vpow2.f32 %v498_v26 }
 0x363   :  { %v1401_v27 = vpop.eup %1400 }
 0x367   :  { %v1403_v28 = vpop.eup %1402 }
 0x368   :  { %v516_v29 = vpack.c.bf16 %v1403_v28, %v1401_v27 }
 0x36a   :  { %1253 = vmatmul.mubr.bf16.vlgmr.msra.gmra.mrb[8].mxu0 %v516_v29 }
 0x36b   :  { %1292 = vmatprep.mubr.msk.bf16.mxu0 %vm1526_vm0, %v1525_v0  ;;  %1277 = vmatpush3.bf16.msra.mxu0 %v1384_v6 }
 0x36c   :  { %1278 = vmatprep.subr.bf16.mxu0 %v1525_v0 }
 0x36f   :  { %1279 = vmatpush3.bf16.msra.mxu0 %v1385_v17 }
 0x370   :  { %1280 = vmatprep.subr.bf16.mxu0 %v1525_v0 }
 0x373   :  { %1281 = vmatpush3.bf16.msra.mxu0 %v1386_v18 }
 0x374   :  { %1282 = vmatprep.subr.bf16.mxu0 %v1525_v0 }
 0x377   :  { %1283 = vmatpush3.bf16.msra.mxu0 %v1387_v19 }
 0x378   :  { %1284 = vmatprep.subr.bf16.mxu0 %v1525_v0 }
 0x37b   :  { %1285 = vmatpush3.bf16.msra.mxu0 %v1388_v20  ;;  %v905_v20 = vrot.slane %v1677_v7, %v66_v32  ;;  %v1027_v32 = vrot.slane %v1677_v7, %v722_v60 }
 0x37c   :  { %1286 = vmatprep.subr.bf16.mxu0 %v1525_v0 }
 0x37f   :  { %1287 = vmatpush3.bf16.msra.mxu0 %v1389_v21 }
 0x380   :  { %1288 = vmatprep.subr.bf16.mxu0 %v1525_v0 }
 0x383   :  { %1289 = vmatpush3.bf16.msra.mxu0 %v1390_v22 }
 0x384   :  { %1290 = vmatprep.subr.bf16.mxu0 %v1525_v0 }
 0x387   :  { %1291 = vmatpush3.bf16.msra.mxu0 %v1391_v23 }
 0x43d   :  { %v599_v40 = vpop.f32.mrb[8].mxu0 }
 0x43e   :  { %v600_v41 = vadd.f32 1e-30, %v599_v40  ;;  %v1254_v42 = vpop.f32.mrb[9].mxu0 }
 0x43f   :  { %v602_v43 = vpop.f32.mrb[10].mxu0 }
 0x440   :  { %1404 = vrcp.f32 %v600_v41  ;;  %v603_v44 = vadd.f32 1e-30, %v602_v43  ;;  %v1255_v45 = vpop.f32.mrb[11].mxu0  ;;  %v763_v43 = vrot.slane %v1609_v33, %v762_v37 }
 0x442   :  { %1406 = vrcp.f32 %v603_v44 }
 0x44a   :  { %v1405_v48 = vpop.eup %1404 }
 0x44b   :  { %v608_v52 = vmul.f32 %v1405_v48, %v1401_v27  ;;  %v785_v48 = vsub.s32 7, %v1606_v31 }
 0x44c   :  { %v1407_v53 = vpop.eup %1406 }
 0x44d   :  { %v609_v56 = vmul.f32 %v1407_v53, %v1403_v28  ;;  %v610_v57 = vmul.f32 %v608_v52, %v380_v49  ;;  %v786_v49 = vrot.slane %v1609_v33, %v785_v48 }
 0x44f   :  { %v611_v58 = vmul.f32 %v609_v56, %v381_v54 }
 0x451   :  { %v628_v59 = vpack.c.bf16 %v611_v58, %v610_v57 }
 0x453   :  { %1273 = vmatmul.mubr.bf16.vlgmr.msra.gmra.mrb[8].mxu1 %v628_v59 }
 0x454   :  { %1312 = vmatprep.mubr.msk.bf16.mxu1 %vm1526_vm0, %v1525_v0 }
 0x526   :  { %v711_v63 = vpop.f32.mrb[8].mxu1 }
 0x527   :  { %v718_v55 = vadd.f32 %v711_v63, %v1614_v38  ;;  %v1274_v1 = vpop.f32.mrb[9].mxu1  ;;  %v1392_v63 = vld [vmem:[#allocation5 + $0x20] ss:$36 sps:$4 sm:$0xff]  }
 0x528   :  { %v714_v2 = vpop.f32.mrb[10].mxu1  ;;  %1297 = vmatpush3.bf16.msra.mxu1 %v1392_v63 }
 0x529   :  { %v719_v61 = vadd.f32 %v714_v2, %v1616_v39  ;;  %v1275_v3 = vpop.f32.mrb[11].mxu1  ;;  %v724_v4 = vadd.f32 %v723_v62, %v718_v55  ;;  %v1393_v55 = vld [vmem:[#allocation5 + $0x68] ss:$36 sps:$4 sm:$0xff]   ;;  %1298 = vmatprep.subr.bf16.mxu1 %v1525_v0 }
 0x52b   :  { %726 = vadd.xlane.f32.xlu1 %v724_v4  ;;  %v725_v5 = vadd.f32 %v723_v62, %v719_v61 }
 0x52c   :  { %1299 = vmatpush3.bf16.msra.mxu1 %v1393_v55 }
 0x52d   :  { %1300 = vmatprep.subr.bf16.mxu1 %v1525_v0 }
 0x52f   :  { %728 = vadd.xlane.f32.xlu1 %v725_v5 }
 0x5b8   :  { %v727_v8 = vpop.xlane.xlu1 %726 }
 0x5b9   :  { %v730_v38 = vmul.f32 0.03125, %v727_v8 }
 0x5bb   :  { %v732_v10 = vsub.f32 %v724_v4, %v730_v38 }
 0x5bc   :  { %v729_v11 = vpop.xlane.xlu1 %728 }
 0x5bd   :  { %v731_v12 = vmul.f32 0.03125, %v729_v11  ;;  %v738_v39 = vmul.f32 %v1680_v9, %v732_v10  ;;  %v1394_v10 = vld [vmem:[#allocation5 + $0xb0] ss:$36 sps:$4 sm:$0xff]   ;;  %v1395_v11 = vld [vmem:[#allocation5 + $0xf8] ss:$36 sps:$4 sm:$0xff]  }
 0x5be   :  { %1301 = vmatpush3.bf16.msra.mxu1 %v1394_v10 }
 0x5bf   :  { %v733_v13 = vsub.f32 %v725_v5, %v731_v12  ;;  %v740_v14 = vmul.f32 %v738_v39, %v738_v39  ;;  %1302 = vmatprep.subr.bf16.mxu1 %v1525_v0  ;;  %v1396_v12 = vld [vmem:[#allocation5 + $0x140] ss:$36 sps:$4 sm:$0xff]  }
 0x5c1   :  { %742 = vadd.xlane.f32.xlu0 %v740_v14  ;;  %v739_v15 = vmul.f32 %v1680_v9, %v733_v13  ;;  %v1399_v13 = vld [vmem:[#allocation5 + $0x218] ss:$36 sps:$4 sm:$0xff]  }
 0x5c2   :  { %1303 = vmatpush3.bf16.msra.mxu1 %v1395_v11 }
 0x5c3   :  { %v741_v16 = vmul.f32 %v739_v15, %v739_v15  ;;  %1304 = vmatprep.subr.bf16.mxu1 %v1525_v0 }
 0x5c5   :  { %744 = vadd.xlane.f32.xlu1 %v741_v16 }
 0x5c6   :  { %1305 = vmatpush3.bf16.msra.mxu1 %v1396_v12 }
 0x5c7   :  { %1306 = vmatprep.subr.bf16.mxu1 %v1525_v0 }
 0x64e   :  { %v743_v24 = vpop.xlane.xlu0 %742 }
 0x64f   :  { %v746_v25 = vmul.f32 0.03125, %v743_v24 }
 0x651   :  { %v748_v26 = vadd.f32 1e-05, %v746_v25 }
 0x652   :  { %v745_v27 = vpop.xlane.xlu1 %744 }
 0x653   :  { %1408 = vrsqrt.f32 %v748_v26  ;;  %v747_v28 = vmul.f32 0.03125, %v745_v27 }
 0x655   :  { %v749_v29 = vadd.f32 1e-05, %v747_v28 }
 0x657   :  { %1410 = vrsqrt.f32 %v749_v29 }
 0x65d   :  { %v1409_v34 = vpop.eup %1408 }
 0x65e   :  { %v752_v35 = vmul.f32 %v1409_v34, %v738_v39  ;;  %v1397_v39 = vld [vmem:[#allocation5 + $0x188] ss:$36 sps:$4 sm:$0xff]  }
 0x65f   :  { %1307 = vmatpush3.bf16.msra.mxu1 %v1397_v39 }
 0x660   :  { %v758_v42 = vmul.f32 %v757_v36, %v752_v35  ;;  %1308 = vmatprep.subr.bf16.mxu1 %v1525_v0 }
 0x661   :  { %v1411_v40 = vpop.eup %1410 }
 0x662   :  { %v753_v41 = vmul.f32 %v1411_v40, %v739_v15  ;;  %v764_v45 = vadd.f32 %v763_v43, %v758_v42 }
 0x664   :  { %v759_v44 = vmul.f32 %v757_v36, %v753_v41 }
 0x666   :  { %v765_v46 = vadd.f32 %v763_v43, %v759_v44 }
 0x668   :  { %v782_v47 = vpack.c.bf16 %v765_v46, %v764_v45 }
 0x66a   :  { %1293 = vmatmul.mubr.bf16.vlgmr.msra.gmra.mrb[12].mxu0 %v782_v47 }
 0x73d   :  { %v869_v52 = vpop.f32.mrb[12].mxu0 }
 0x73e   :  { %v870_v53 = vadd.f32 %v869_v52, %v786_v49  ;;  %v1294_v54 = vpop.f32.mrb[13].mxu0 }
 0x73f   :  { %v872_v56 = vpop.f32.mrb[14].mxu0 }
 0x740   :  { %v876_v57 = vmax.f32 %v870_v53, 0.0  ;;  %v873_v58 = vadd.f32 %v872_v56, %v786_v49  ;;  %v1295_v59 = vpop.f32.mrb[15].mxu0 }
 0x742   :  { %v877_v62 = vmax.f32 %v873_v58, 0.0  ;;  %878 = vadd.xlane.f32.xlu0 %v876_v57 }
 0x744   :  { %880 = vadd.xlane.f32.xlu1 %v877_v62 }
 0x7cf   :  { %v879_v1 = vpop.xlane.xlu0 %878 }
 0x7d0   :  { %v882_v33 = vmul.f32 0.03125, %v879_v1 }
 0x7d1   :  { %v881_v2 = vpop.xlane.xlu1 %880 }
 0x7d2   :  { %v884_v61 = vsub.f32 %v876_v57, %v882_v33  ;;  %v883_v3 = vmul.f32 0.03125, %v881_v2 }
 0x7d4   :  { %v885_v4 = vsub.f32 %v877_v62, %v883_v3  ;;  %v886_v5 = vmul.f32 %v884_v61, %v1680_v9 }
 0x7d6   :  { %v888_v6 = vmul.f32 %v886_v5, %v886_v5  ;;  %v887_v8 = vmul.f32 %v885_v4, %v1680_v9  ;;  %v1398_v9 = vld [vmem:[#allocation5 + $0x1d0] ss:$36 sps:$4 sm:$0xff]  }
 0x7d7   :  { %1309 = vmatpush3.bf16.msra.mxu1 %v1398_v9 }
 0x7d8   :  { %890 = vadd.xlane.f32.xlu0 %v888_v6  ;;  %v889_v38 = vmul.f32 %v887_v8, %v887_v8  ;;  %1310 = vmatprep.subr.bf16.mxu1 %v1525_v0  ;;  %v911_v0 = vrot.slane %v1677_v7, %v366_v50 }
 0x7da   :  { %892 = vadd.xlane.f32.xlu1 %v889_v38 }
 0x7db   :  { %1311 = vmatpush3.bf16.msra.mxu1 %v1399_v13 }
 0x865   :  { %v891_v14 = vpop.xlane.xlu0 %890 }
 0x866   :  { %v894_v15 = vmul.f32 0.03125, %v891_v14 }
 0x867   :  { %v893_v16 = vpop.xlane.xlu1 %892 }
 0x868   :  { %v896_v17 = vadd.f32 1e-05, %v894_v15  ;;  %v895_v18 = vmul.f32 0.03125, %v893_v16 }
 0x86a   :  { %1412 = vrsqrt.f32 %v896_v17  ;;  %v897_v19 = vadd.f32 1e-05, %v895_v18 }
 0x86c   :  { %1414 = vrsqrt.f32 %v897_v19 }
 0x874   :  { %v1413_v21 = vpop.eup %1412 }
 0x875   :  { %v900_v22 = vmul.f32 %v1413_v21, %v886_v5 }
 0x876   :  { %v1415_v23 = vpop.eup %1414 }
 0x877   :  { %v901_v24 = vmul.f32 %v1415_v23, %v887_v8  ;;  %v906_v25 = vmul.f32 %v905_v20, %v900_v22 }
 0x879   :  { %v907_v26 = vmul.f32 %v905_v20, %v901_v24  ;;  %v912_v27 = vadd.f32 %v911_v0, %v906_v25 }
 0x87b   :  { %v913_v28 = vadd.f32 %v911_v0, %v907_v26 }
 0x87d   :  { %v930_v29 = vpack.c.bf16 %v913_v28, %v912_v27 }
 0x87f   :  { %1313 = vmatmul.mubr.bf16.vlgmr.msra.gmra.mrb[12].mxu1 %v930_v29 }
 0x952   :  { %v1017_v34 = vpop.f32.mrb[12].mxu1 }
 0x953   :  { %v1018_v35 = vadd.f32 %v1017_v34, %v934_v30  ;;  %v1314_v36 = vpop.f32.mrb[13].mxu1 }
 0x954   :  { %v1020_v37 = vpop.f32.mrb[14].mxu1 }
 0x955   :  { %v1021_v50 = vadd.f32 %v1020_v37, %v934_v30  ;;  %v1315_v40 = vpop.f32.mrb[15].mxu1  ;;  %v1028_v41 = vadd.f32 %v1027_v32, %v1018_v35 }
 0x957   :  { %1030 = vmax.xlane.f32.xlu0 %v1028_v41  ;;  %v1029_v42 = vadd.f32 %v1027_v32, %v1021_v50 }
 0x959   :  { %1032 = vmax.xlane.f32.xlu1 %v1029_v42 }
 0x9e4   :  { %v1031_v43 = vpop.xlane.xlu0 %1030 }
 0x9e5   :  { %v1034_v44 = vsub.f32 %v1028_v41, %v1031_v43 }
 0x9e6   :  { %v1033_v45 = vpop.xlane.xlu1 %1032 }
 0x9e7   :  { %v1036_v46 = vmul.f32 1.442695, %v1034_v44  ;;  %v1035_v47 = vsub.f32 %v1029_v42, %v1033_v45 }
 0x9e9   :  { %1416 = vpow2.f32 %v1036_v46  ;;  %v1038_v51 = vmul.f32 1.442695, %v1035_v47 }
 0x9eb   :  { %1418 = vpow2.f32 %v1038_v51 }
 0x9f3   :  { %v1417_v31 = vpop.eup %1416 }
 0x9f4   :  { %1040 = vadd.xlane.f32.xlu0 %v1417_v31 }
 0x9f5   :  { %v1419_v60 = vpop.eup %1418 }
 0x9f6   :  { %1042 = vadd.xlane.f32.xlu1 %v1419_v60 }
 0xa81   :  { %v1041_v7 = vpop.xlane.xlu0 %1040 }
 0xa82   :  { %1420 = vrcp.f32 %v1041_v7 }
 0xa83   :  { %v1043_v48 = vpop.xlane.xlu1 %1042 }
 0xa84   :  { %1422 = vrcp.f32 %v1043_v48 }
 0xa8c   :  { %v1421_v49 = vpop.eup %1420 }
 0xa8d   :  { %v1045_v52 = vmul.f32 %v1421_v49, %v1417_v31 }
 0xa8e   :  { %v1423_v53 = vpop.eup %1422 }
 0xa8f   :  { %v1047_v54 = vmul.f32 %v1423_v53, %v1419_v60  ;;  %1048 = vst [vmem:[#allocation8] sm:$0xff] %v1045_v52 }
 0xa91   :  { %1049 = vst [vmem:[#allocation8 + $0x8] sm:$0xff] %v1047_v54 }
 0xa92   :  { %1501 = shalt.err (!%p1498_p0)
}
 0xa93   :  { %s1502_s27 = scalar_lea.hbm %s1735_s3, 256 }
 0xa94   :  { %p1503_p1 = scmp.ne.s32.totalorder %s1735_s3, %s1502_s27  ;;  %p1506_p2 = scmp.lt.u32.totalorder %s1502_s27, %s1735_s3 }
 0xa96   :  { %p1508_p3 = pnand %p1506_p2, %p1503_p1 }
 0xa98   :  { %1511 = shalt.err (!%p1508_p3)
}
 0xa99   :  { %1061 = dma.vmem_to_hbm [thread:$0]  %s1056_s23, 256, %s1735_s3, [#allocation4], %s1522_s1, %s1522_s1, %s1523_s9  }
 0xa9a   :  { %1516 = dma.done.wait [#allocation4], 256  }
 0xa9b   :  { %1517 = vsyncadd [#allocation4], 4294967040 }
 0xa9c   :  { %1065 = vsyncpa [#allocation3], 1 }
 0xa9d   :  { %1066 = vsyncpa [#allocation6], 1 }
 0xa9e   :  { %1067 = vsyncpa [#allocation4], 1 }

</bundles_post_ra>
